<compile_context>
chip_gen: v5e
topology: v5e:2x2
jax: 0.10.0
libtpu: 0.0.40
codegen_flags: <defaults>
</compile_context>

<pallas_src>
import functools

import jax
import jax.numpy as jnp
from jax.experimental import pallas as pl
from jax.experimental.pallas import tpu as pltpu

LN_EPS = 1e-5
_INV_SQRT2 = 0.7071067811865476
_GELU_TANH_C = 0.7978845608028654  # sqrt(2/pi)


def _round_up(v, m):
    return (v + m - 1) // m * m


def map_network_kernel(x_ref, w1_ref, b1_ref, g_ref, beta_ref, w2_ref, b2_ref, o_ref,
                       *, tail_rows, approx_gelu):
    x = x_ref[...]

    # Zero-mask garbage rows of the (single) partial last block so no stray NaN/Inf
    # flows through erf/rsqrt. Those rows are never stored (masked output), but this
    # keeps the math clean. Compiled in only when B % tb != 0.
    if tail_rows:
        is_last = pl.program_id(0) == pl.num_programs(0) - 1
        rows = jax.lax.broadcasted_iota(jnp.int32, x.shape, 0)
        x = jnp.where(jnp.logical_and(is_last, rows >= tail_rows), 0.0, x)

    # Linear(input_dim -> hidden_dim): MXU path in the weights' dtype, f32 accumulation.
    h = jnp.dot(x.astype(w1_ref.dtype), w1_ref[...],
                preferred_element_type=jnp.float32) + b1_ref[...]

    # GELU (exact erf by default -- matches torch.nn.GELU() numerics).
    if approx_gelu:
        h = 0.5 * h * (1.0 + jnp.tanh(_GELU_TANH_C * (h + 0.044715 * h * h * h)))
    else:
        h = 0.5 * h * (1.0 + jax.lax.erf(h * jnp.float32(_INV_SQRT2)))

    # LayerNorm over hidden_dim (biased variance, like torch.nn.LayerNorm). f32 math
    # throughout (also correct for v5e, which has no bf16 VPU/EUP path).
    mean = jnp.mean(h, axis=-1, keepdims=True)
    centered = h - mean
    var = jnp.mean(centered * centered, axis=-1, keepdims=True)
    h = centered * jax.lax.rsqrt(var + jnp.float32(LN_EPS))
    h = h * g_ref[...] + beta_ref[...]

    # TODO(synk): Dropout is identity in eval mode; training-mode masking
    # (pltpu.prng_seed + pltpu.prng_random_bits) not implemented.

    # Linear(hidden_dim -> output_dim).
    y = jnp.dot(h.astype(w2_ref.dtype), w2_ref[...],
                preferred_element_type=jnp.float32) + b2_ref[...]
    o_ref[...] = y.astype(o_ref.dtype)


def prepare_params(raw, weight_dtype=jnp.bfloat16):
    """One-time param prep (call once, NOT per forward): weight cast + (1, D) biases."""
    return {
        "w1": raw["w1"].astype(weight_dtype),                  # [Din, H]
        "b1": raw["b1"].reshape(1, -1).astype(jnp.float32),    # [1, H]
        "gamma": raw["gamma"].reshape(1, -1).astype(jnp.float32),
        "beta": raw["beta"].reshape(1, -1).astype(jnp.float32),
        "w2": raw["w2"].astype(weight_dtype),                  # [H, Dout]
        "b2": raw["b2"].reshape(1, -1).astype(jnp.float32),    # [1, Dout]
    }


def _vmem_budget_bytes():
    cap = None
    try:
        cap = getattr(pltpu.get_tpu_info(), "vmem_capacity_bytes", None)
    except Exception:
        cap = None
    if not cap:
        cap = 64 << 20  # assume smallest generation (v7x: 64 MiB / TC) when unknown
    return max(32 << 20, int(cap * 0.85))  # ~15% headroom


def _pick_tile(B, block_batch, Din, H, Dout, x_itemsize, w_itemsize, vmem_budget):
    if block_batch is not None:
        tb = int(block_batch)
    else:
        # Aim for >=4 grid steps (pipelining everywhere, >=2 steps per v7x TC) with a
        # ~256-row floor so the ~0.35us/step overhead stays amortized.
        tb = max(256, -(-B // 4))
    tb = _round_up(min(tb, _round_up(B, 8)), 8)

    # Double-buffered streaming tiles + f32 intermediates + (worst case) 2x params.
    param_bytes = 2 * ((Din * H + H * Dout) * w_itemsize + (3 * H + Dout) * 4)

    def need(t):
        return 2 * t * (Din + Dout) * x_itemsize + 3 * t * H * 4 + param_bytes

    while tb > 256 and need(tb) > int(0.8 * vmem_budget):
        tb = max(256, _round_up(tb // 2, 8))
    return max(tb, 8)


def map_network_forward(x, params, *, block_batch=None, approx_gelu=False):
    """x: [B, input_dim].  params: output of prepare_params()."""
    B, Din = x.shape
    H = params["w1"].shape[1]
    Dout = params["w2"].shape[1]
    assert params["w1"].shape[0] == Din and params["w2"].shape[0] == H

    vmem_budget = _vmem_budget_bytes()
    tb = _pick_tile(B, block_batch, Din, H, Dout,
                    x.dtype.itemsize, params["w1"].dtype.itemsize, vmem_budget)
    grid_len = pl.cdiv(B, tb)
    tail_rows = B % tb  # 0 => every block is full

    kernel = functools.partial(map_network_kernel,
                               tail_rows=tail_rows, approx_gelu=approx_gelu)

    def build(single_buffer_params):
        if single_buffer_params:
            # Grid-invariant operands: one VMEM buffer is enough (saves VMEM for tiles).
            const = lambda shape: pl.BlockSpec(shape, lambda i: (0, 0),
                                               pipeline_mode=pl.Buffered(1))
        else:
            const = lambda shape: pl.BlockSpec(shape, lambda i: (0, 0))
        return pl.pallas_call(
            kernel,
            out_shape=jax.ShapeDtypeStruct((B, Dout), x.dtype),
            grid_spec=pltpu.PrefetchScalarGridSpec(
                num_scalar_prefetch=0,
                grid=(grid_len,),
                in_specs=[
                    pl.BlockSpec((tb, Din), lambda i: (i, 0)),   # x tile (streams)
                    const((Din, H)),                             # W1 (resident)
                    const((1, H)),                               # b1
                    const((1, H)),                               # LayerNorm gamma
                    const((1, H)),                               # LayerNorm beta
                    const((H, Dout)),                            # W2 (resident)
                    const((1, Dout)),                            # b2
                ],
                out_specs=pl.BlockSpec((tb, Dout), lambda i: (i, 0)),
            ),
            compiler_params=pltpu.CompilerParams(
                dimension_semantics=("parallel",),   # lets v7x shard batch over 2 TCs
                vmem_limit_bytes=vmem_budget,
            ),
        )

    args = (x, params["w1"], params["b1"], params["gamma"], params["beta"],
            params["w2"], params["b2"])
    try:
        return build(True)(*args)
    except Exception:
        # Some JAX versions may reject pl.Buffered(1); fall back to default buffering.
        return build(False)(*args)


def init_params(key, input_dim, hidden_dim, output_dim):
    """Deterministic synthetic init (PyTorch-like uniform for the linears)."""
    k1, k2, k3, k4 = jax.random.split(key, 4)
    lim1 = 1.0 / jnp.sqrt(input_dim)
    lim2 = 1.0 / jnp.sqrt(hidden_dim)
    return {
        # stored transposed relative to torch ([in, out] instead of [out, in])
        "w1": jax.random.uniform(k1, (input_dim, hidden_dim), jnp.float32, -lim1, lim1),
        "b1": jax.random.uniform(k2, (hidden_dim,), jnp.float32, -lim1, lim1),
        "gamma": jnp.ones((hidden_dim,), jnp.float32),
        "beta": jnp.zeros((hidden_dim,), jnp.float32),
        "w2": jax.random.uniform(k3, (hidden_dim, output_dim), jnp.float32, -lim2, lim2),
        "b2": jax.random.uniform(k4, (output_dim,), jnp.float32, -lim2, lim2),
    }


def map_network_ref(x, p):
    """Pure-f32 reference (matches the PyTorch module in eval mode)."""
    h = x @ p["w1"] + p["b1"]
    h = 0.5 * h * (1.0 + jax.lax.erf(h / jnp.sqrt(2.0)))
    mean = jnp.mean(h, axis=-1, keepdims=True)
    var = jnp.mean((h - mean) ** 2, axis=-1, keepdims=True)
    h = (h - mean) / jnp.sqrt(var + LN_EPS)
    h = h * p["gamma"] + p["beta"]
    return h @ p["w2"] + p["b2"]


if __name__ == "__main__":
    key = jax.random.PRNGKey(0)
    kx, kp = jax.random.split(key)

    # batch deliberately NOT a multiple of the tile -> exercises the cdiv grid with a
    # masked partial last block (4 steps of 8 rows; last step has 6 valid rows).
    batch, input_dim, hidden_dim, output_dim = 30, 64, 128, 32
    x = jax.random.normal(kx, (batch, input_dim), jnp.float32)

    raw = init_params(kp, input_dim, hidden_dim, output_dim)
    params = prepare_params(raw)            # one-time bf16 cast / layout prep

    out = map_network_forward(x, params, block_batch=8)
    out = jax.block_until_ready(out)

    ref = map_network_ref(x, raw)
    assert out.shape == (batch, output_dim), out.shape
    # bf16 matmul inputs with f32 accumulation vs. f32 reference.
    err = float(jnp.max(jnp.abs(out - ref)))
    assert jnp.allclose(out, ref, atol=2e-2, rtol=2e-2), err

    print("KERNEL_OK")
</pallas_src>

<mosaic_0001>
module attributes {stable_mosaic.version = 11 : i64} {
  func.func @map_network_kernel(%arg0: i32, %arg1: memref<8x64xf32, #tpu.memory_space<vmem>>, %arg2: memref<64x128xbf16, #tpu.memory_space<vmem>>, %arg3: memref<1x128xf32, #tpu.memory_space<vmem>>, %arg4: memref<1x128xf32, #tpu.memory_space<vmem>>, %arg5: memref<1x128xf32, #tpu.memory_space<vmem>>, %arg6: memref<128x32xbf16, #tpu.memory_space<vmem>>, %arg7: memref<1x32xf32, #tpu.memory_space<vmem>>, %arg8: memref<8x32xf32, #tpu.memory_space<vmem>>) attributes {dimension_semantics = [#tpu.dimension_semantics<parallel>], iteration_bounds = array<i64: 4>, scalar_prefetch = 0 : i64, scratch_operands = 0 : i64, tpu.core_type = #tpu.core_type<tc>, window_params = [{transform_indices = @transform_0, window_bounds = array<i64: 8, 64>}, {pipeline_mode = #tpu.pipeline_mode<synchronous>, transform_indices = @transform_1, window_bounds = array<i64: 64, 128>}, {pipeline_mode = #tpu.pipeline_mode<synchronous>, transform_indices = @transform_2, window_bounds = array<i64: 1, 128>}, {pipeline_mode = #tpu.pipeline_mode<synchronous>, transform_indices = @transform_3, window_bounds = array<i64: 1, 128>}, {pipeline_mode = #tpu.pipeline_mode<synchronous>, transform_indices = @transform_4, window_bounds = array<i64: 1, 128>}, {pipeline_mode = #tpu.pipeline_mode<synchronous>, transform_indices = @transform_5, window_bounds = array<i64: 128, 32>}, {pipeline_mode = #tpu.pipeline_mode<synchronous>, transform_indices = @transform_6, window_bounds = array<i64: 1, 32>}, {transform_indices = @transform_7, window_bounds = array<i64: 8, 32>}]} {
    %c0 = arith.constant 0 : index
    %c0_0 = arith.constant 0 : index
    %0 = vector.load %arg1[%c0, %c0_0] : memref<8x64xf32, #tpu.memory_space<vmem>>, vector<8x64xf32>
    %c3_i32 = arith.constant 3 : i32
    %1 = arith.cmpi eq, %arg0, %c3_i32 : i32
    %2 = tpu.iota {dimensions = array<i32: 0>} : vector<8x64xi32>
    %c6_i32 = arith.constant 6 : i32
    %3 = vector.broadcast %c6_i32 : i32 to vector<8x64xi32>
    %4 = arith.cmpi sge, %2, %3 : vector<8x64xi32>
    %5 = vector.broadcast %1 : i1 to vector<8x64xi1>
    %6 = arith.andi %5, %4 : vector<8x64xi1>
    %cst = arith.constant 0.000000e+00 : f32
    %7 = vector.broadcast %cst : f32 to vector<8x64xf32>
    %8 = arith.select %6, %7, %0 : vector<8x64xi1>, vector<8x64xf32>
    %9 = arith.truncf %8 : vector<8x64xf32> to vector<8x64xbf16>
    %c0_1 = arith.constant 0 : index
    %c0_2 = arith.constant 0 : index
    %10 = vector.load %arg2[%c0_1, %c0_2] : memref<64x128xbf16, #tpu.memory_space<vmem>>, vector<64x128xbf16>
    %cst_3 = arith.constant dense<0.000000e+00> : vector<8x128xf32>
    %11 = tpu.matmul %9, %10, %cst_3 {dimension_numbers = #tpu.dot_dimension_numbers<[1], [0], [0], [1], [0, 0, 1, 1], [], []>} : vector<8x64xbf16>, vector<64x128xbf16>, vector<8x128xf32> -> vector<8x128xf32>
    %c0_4 = arith.constant 0 : index
    %c0_5 = arith.constant 0 : index
    %12 = vector.load %arg3[%c0_4, %c0_5] : memref<1x128xf32, #tpu.memory_space<vmem>>, vector<1x128xf32>
    %13 = vector.broadcast %12 : vector<1x128xf32> to vector<8x128xf32>
    %14 = arith.addf %11, %13 : vector<8x128xf32>
    %cst_6 = arith.constant 5.000000e-01 : f32
    %15 = vector.broadcast %cst_6 : f32 to vector<8x128xf32>
    %16 = arith.mulf %15, %14 : vector<8x128xf32>
    %cst_7 = arith.constant 0.707106769 : f32
    %17 = vector.broadcast %cst_7 : f32 to vector<8x128xf32>
    %18 = arith.mulf %14, %17 : vector<8x128xf32>
    %19 = math.erf %18 : vector<8x128xf32>
    %cst_8 = arith.constant 1.000000e+00 : f32
    %20 = vector.broadcast %cst_8 : f32 to vector<8x128xf32>
    %21 = arith.addf %20, %19 : vector<8x128xf32>
    %22 = arith.mulf %16, %21 : vector<8x128xf32>
    %cst_9 = arith.constant dense<0.000000e+00> : vector<8xf32>
    %23 = vector.multi_reduction <add>, %22, %cst_9 [1] : vector<8x128xf32> to vector<8xf32>
    %24 = vector.shape_cast %23 : vector<8xf32> to vector<8x1xf32>
    %cst_10 = arith.constant 1.280000e+02 : f32
    %25 = vector.broadcast %cst_10 : f32 to vector<8x1xf32>
    %26 = arith.divf %24, %25 : vector<8x1xf32>
    %27 = vector.broadcast %26 : vector<8x1xf32> to vector<8x128xf32>
    %28 = arith.subf %22, %27 : vector<8x128xf32>
    %29 = arith.mulf %28, %28 : vector<8x128xf32>
    %cst_11 = arith.constant dense<0.000000e+00> : vector<8xf32>
    %30 = vector.multi_reduction <add>, %29, %cst_11 [1] : vector<8x128xf32> to vector<8xf32>
    %31 = vector.shape_cast %30 : vector<8xf32> to vector<8x1xf32>
    %cst_12 = arith.constant 1.280000e+02 : f32
    %32 = vector.broadcast %cst_12 : f32 to vector<8x1xf32>
    %33 = arith.divf %31, %32 : vector<8x1xf32>
    %cst_13 = arith.constant 9.99999974E-6 : f32
    %34 = vector.broadcast %cst_13 : f32 to vector<8x1xf32>
    %35 = arith.addf %33, %34 : vector<8x1xf32>
    %36 = math.rsqrt %35 : vector<8x1xf32>
    %37 = vector.broadcast %36 : vector<8x1xf32> to vector<8x128xf32>
    %38 = arith.mulf %28, %37 : vector<8x128xf32>
    %c0_14 = arith.constant 0 : index
    %c0_15 = arith.constant 0 : index
    %39 = vector.load %arg4[%c0_14, %c0_15] : memref<1x128xf32, #tpu.memory_space<vmem>>, vector<1x128xf32>
    %40 = vector.broadcast %39 : vector<1x128xf32> to vector<8x128xf32>
    %41 = arith.mulf %38, %40 : vector<8x128xf32>
    %c0_16 = arith.constant 0 : index
    %c0_17 = arith.constant 0 : index
    %42 = vector.load %arg5[%c0_16, %c0_17] : memref<1x128xf32, #tpu.memory_space<vmem>>, vector<1x128xf32>
    %43 = vector.broadcast %42 : vector<1x128xf32> to vector<8x128xf32>
    %44 = arith.addf %41, %43 : vector<8x128xf32>
    %45 = arith.truncf %44 : vector<8x128xf32> to vector<8x128xbf16>
    %c0_18 = arith.constant 0 : index
    %c0_19 = arith.constant 0 : index
    %46 = vector.load %arg6[%c0_18, %c0_19] : memref<128x32xbf16, #tpu.memory_space<vmem>>, vector<128x32xbf16>
    %cst_20 = arith.constant dense<0.000000e+00> : vector<8x32xf32>
    %47 = tpu.matmul %45, %46, %cst_20 {dimension_numbers = #tpu.dot_dimension_numbers<[1], [0], [0], [1], [0, 0, 1, 1], [], []>} : vector<8x128xbf16>, vector<128x32xbf16>, vector<8x32xf32> -> vector<8x32xf32>
    %c0_21 = arith.constant 0 : index
    %c0_22 = arith.constant 0 : index
    %48 = vector.load %arg7[%c0_21, %c0_22] : memref<1x32xf32, #tpu.memory_space<vmem>>, vector<1x32xf32>
    %49 = vector.broadcast %48 : vector<1x32xf32> to vector<8x32xf32>
    %50 = arith.addf %47, %49 : vector<8x32xf32>
    %c0_23 = arith.constant 0 : index
    %c0_24 = arith.constant 0 : index
    %51 = vector.load %arg8[%c0_23, %c0_24] : memref<8x32xf32, #tpu.memory_space<vmem>>, vector<8x32xf32>
    tpu.vector_store %arg8[%c0_23, %c0_24], %50 {strides = array<i32>} : memref<8x32xf32, #tpu.memory_space<vmem>>, vector<8x32xf32>,
    return
  }
  func.func @transform_0(%arg0: i32) -> (i32, i32) {
    %c0_i32 = arith.constant 0 : i32
    %c0_i32_0 = arith.constant 0 : i32
    return %arg0, %c0_i32 : i32, i32
  }
  func.func @transform_1(%arg0: i32) -> (i32, i32) {
    %c0_i32 = arith.constant 0 : i32
    %c0_i32_0 = arith.constant 0 : i32
    %c0_i32_1 = arith.constant 0 : i32
    return %c0_i32, %c0_i32_0 : i32, i32
  }
  func.func @transform_2(%arg0: i32) -> (i32, i32) {
    %c0_i32 = arith.constant 0 : i32
    %c0_i32_0 = arith.constant 0 : i32
    %c0_i32_1 = arith.constant 0 : i32
    return %c0_i32, %c0_i32_0 : i32, i32
  }
  func.func @transform_3(%arg0: i32) -> (i32, i32) {
    %c0_i32 = arith.constant 0 : i32
    %c0_i32_0 = arith.constant 0 : i32
    %c0_i32_1 = arith.constant 0 : i32
    return %c0_i32, %c0_i32_0 : i32, i32
  }
  func.func @transform_4(%arg0: i32) -> (i32, i32) {
    %c0_i32 = arith.constant 0 : i32
    %c0_i32_0 = arith.constant 0 : i32
    %c0_i32_1 = arith.constant 0 : i32
    return %c0_i32, %c0_i32_0 : i32, i32
  }
  func.func @transform_5(%arg0: i32) -> (i32, i32) {
    %c0_i32 = arith.constant 0 : i32
    %c0_i32_0 = arith.constant 0 : i32
    %c0_i32_1 = arith.constant 0 : i32
    return %c0_i32, %c0_i32_0 : i32, i32
  }
  func.func @transform_6(%arg0: i32) -> (i32, i32) {
    %c0_i32 = arith.constant 0 : i32
    %c0_i32_0 = arith.constant 0 : i32
    %c0_i32_1 = arith.constant 0 : i32
    return %c0_i32, %c0_i32_0 : i32, i32
  }
  func.func @transform_7(%arg0: i32) -> (i32, i32) {
    %c0_i32 = arith.constant 0 : i32
    %c0_i32_0 = arith.constant 0 : i32
    return %arg0, %c0_i32 : i32, i32
  }
}

module attributes {stable_mosaic.version = 11 : i64} {
  func.func @map_network_kernel(%arg0: i32, %arg1: memref<8x64xf32, #tpu.memory_space<vmem>>, %arg2: memref<64x128xbf16, #tpu.memory_space<vmem>>, %arg3: memref<1x128xf32, #tpu.memory_space<vmem>>, %arg4: memref<1x128xf32, #tpu.memory_space<vmem>>, %arg5: memref<1x128xf32, #tpu.memory_space<vmem>>, %arg6: memref<128x32xbf16, #tpu.memory_space<vmem>>, %arg7: memref<1x32xf32, #tpu.memory_space<vmem>>, %arg8: memref<8x32xf32, #tpu.memory_space<vmem>>) attributes {dimension_semantics = [#tpu.dimension_semantics<parallel>], iteration_bounds = array<i64: 4>, scalar_prefetch = 0 : i64, scratch_operands = 0 : i64, tpu.core_type = #tpu.core_type<tc>, window_params = [{transform_indices = @transform_0, window_bounds = array<i64: 8, 64>}, {pipeline_mode = #tpu.pipeline_mode<synchronous>, transform_indices = @transform_1, window_bounds = array<i64: 64, 128>}, {pipeline_mode = #tpu.pipeline_mode<synchronous>, transform_indices = @transform_2, window_bounds = array<i64: 1, 128>}, {pipeline_mode = #tpu.pipeline_mode<synchronous>, transform_indices = @transform_3, window_bounds = array<i64: 1, 128>}, {pipeline_mode = #tpu.pipeline_mode<synchronous>, transform_indices = @transform_4, window_bounds = array<i64: 1, 128>}, {pipeline_mode = #tpu.pipeline_mode<synchronous>, transform_indices = @transform_5, window_bounds = array<i64: 128, 32>}, {pipeline_mode = #tpu.pipeline_mode<synchronous>, transform_indices = @transform_6, window_bounds = array<i64: 1, 32>}, {transform_indices = @transform_7, window_bounds = array<i64: 8, 32>}]} {
    %c0 = arith.constant 0 : index
    %c0_0 = arith.constant 0 : index
    %0 = vector.load %arg1[%c0, %c0_0] : memref<8x64xf32, #tpu.memory_space<vmem>>, vector<8x64xf32>
    %c3_i32 = arith.constant 3 : i32
    %1 = arith.cmpi eq, %arg0, %c3_i32 : i32
    %2 = tpu.iota {dimensions = array<i32: 0>} : vector<8x64xi32>
    %c6_i32 = arith.constant 6 : i32
    %3 = vector.broadcast %c6_i32 : i32 to vector<8x64xi32>
    %4 = arith.cmpi sge, %2, %3 : vector<8x64xi32>
    %5 = vector.broadcast %1 : i1 to vector<8x64xi1>
    %6 = arith.andi %5, %4 : vector<8x64xi1>
    %cst = arith.constant 0.000000e+00 : f32
    %7 = vector.broadcast %cst : f32 to vector<8x64xf32>
    %8 = arith.select %6, %7, %0 : vector<8x64xi1>, vector<8x64xf32>
    %9 = arith.truncf %8 : vector<8x64xf32> to vector<8x64xbf16>
    %c0_1 = arith.constant 0 : index
    %c0_2 = arith.constant 0 : index
    %10 = vector.load %arg2[%c0_1, %c0_2] : memref<64x128xbf16, #tpu.memory_space<vmem>>, vector<64x128xbf16>
    %cst_3 = arith.constant dense<0.000000e+00> : vector<8x128xf32>
    %11 = tpu.matmul %9, %10, %cst_3 {dimension_numbers = #tpu.dot_dimension_numbers<[1], [0], [0], [1], [0, 0, 1, 1], [], []>} : vector<8x64xbf16>, vector<64x128xbf16>, vector<8x128xf32> -> vector<8x128xf32>
    %c0_4 = arith.constant 0 : index
    %c0_5 = arith.constant 0 : index
    %12 = vector.load %arg3[%c0_4, %c0_5] : memref<1x128xf32, #tpu.memory_space<vmem>>, vector<1x128xf32>
    %13 = vector.broadcast %12 : vector<1x128xf32> to vector<8x128xf32>
    %14 = arith.addf %11, %13 : vector<8x128xf32>
    %cst_6 = arith.constant 5.000000e-01 : f32
    %15 = vector.broadcast %cst_6 : f32 to vector<8x128xf32>
    %16 = arith.mulf %15, %14 : vector<8x128xf32>
    %cst_7 = arith.constant 0.707106769 : f32
    %17 = vector.broadcast %cst_7 : f32 to vector<8x128xf32>
    %18 = arith.mulf %14, %17 : vector<8x128xf32>
    %19 = math.erf %18 : vector<8x128xf32>
    %cst_8 = arith.constant 1.000000e+00 : f32
    %20 = vector.broadcast %cst_8 : f32 to vector<8x128xf32>
    %21 = arith.addf %20, %19 : vector<8x128xf32>
    %22 = arith.mulf %16, %21 : vector<8x128xf32>
    %cst_9 = arith.constant dense<0.000000e+00> : vector<8xf32>
    %23 = vector.multi_reduction <add>, %22, %cst_9 [1] : vector<8x128xf32> to vector<8xf32>
    %24 = vector.shape_cast %23 : vector<8xf32> to vector<8x1xf32>
    %cst_10 = arith.constant 1.280000e+02 : f32
    %25 = vector.broadcast %cst_10 : f32 to vector<8x1xf32>
    %26 = arith.divf %24, %25 : vector<8x1xf32>
    %27 = vector.broadcast %26 : vector<8x1xf32> to vector<8x128xf32>
    %28 = arith.subf %22, %27 : vector<8x128xf32>
    %29 = arith.mulf %28, %28 : vector<8x128xf32>
    %cst_11 = arith.constant dense<0.000000e+00> : vector<8xf32>
    %30 = vector.multi_reduction <add>, %29, %cst_11 [1] : vector<8x128xf32> to vector<8xf32>
    %31 = vector.shape_cast %30 : vector<8xf32> to vector<8x1xf32>
    %cst_12 = arith.constant 1.280000e+02 : f32
    %32 = vector.broadcast %cst_12 : f32 to vector<8x1xf32>
    %33 = arith.divf %31, %32 : vector<8x1xf32>
    %cst_13 = arith.constant 9.99999974E-6 : f32
    %34 = vector.broadcast %cst_13 : f32 to vector<8x1xf32>
    %35 = arith.addf %33, %34 : vector<8x1xf32>
    %36 = math.rsqrt %35 : vector<8x1xf32>
    %37 = vector.broadcast %36 : vector<8x1xf32> to vector<8x128xf32>
    %38 = arith.mulf %28, %37 : vector<8x128xf32>
    %c0_14 = arith.constant 0 : index
    %c0_15 = arith.constant 0 : index
    %39 = vector.load %arg4[%c0_14, %c0_15] : memref<1x128xf32, #tpu.memory_space<vmem>>, vector<1x128xf32>
    %40 = vector.broadcast %39 : vector<1x128xf32> to vector<8x128xf32>
    %41 = arith.mulf %38, %40 : vector<8x128xf32>
    %c0_16 = arith.constant 0 : index
    %c0_17 = arith.constant 0 : index
    %42 = vector.load %arg5[%c0_16, %c0_17] : memref<1x128xf32, #tpu.memory_space<vmem>>, vector<1x128xf32>
    %43 = vector.broadcast %42 : vector<1x128xf32> to vector<8x128xf32>
    %44 = arith.addf %41, %43 : vector<8x128xf32>
    %45 = arith.truncf %44 : vector<8x128xf32> to vector<8x128xbf16>
    %c0_18 = arith.constant 0 : index
    %c0_19 = arith.constant 0 : index
    %46 = vector.load %arg6[%c0_18, %c0_19] : memref<128x32xbf16, #tpu.memory_space<vmem>>, vector<128x32xbf16>
    %cst_20 = arith.constant dense<0.000000e+00> : vector<8x32xf32>
    %47 = tpu.matmul %45, %46, %cst_20 {dimension_numbers = #tpu.dot_dimension_numbers<[1], [0], [0], [1], [0, 0, 1, 1], [], []>} : vector<8x128xbf16>, vector<128x32xbf16>, vector<8x32xf32> -> vector<8x32xf32>
    %c0_21 = arith.constant 0 : index
    %c0_22 = arith.constant 0 : index
    %48 = vector.load %arg7[%c0_21, %c0_22] : memref<1x32xf32, #tpu.memory_space<vmem>>, vector<1x32xf32>
    %49 = vector.broadcast %48 : vector<1x32xf32> to vector<8x32xf32>
    %50 = arith.addf %47, %49 : vector<8x32xf32>
    %c0_23 = arith.constant 0 : index
    %c0_24 = arith.constant 0 : index
    %51 = vector.load %arg8[%c0_23, %c0_24] : memref<8x32xf32, #tpu.memory_space<vmem>>, vector<8x32xf32>
    tpu.vector_store %arg8[%c0_23, %c0_24], %50 {strides = array<i32>} : memref<8x32xf32, #tpu.memory_space<vmem>>, vector<8x32xf32>,
    return
  }
  func.func @transform_0(%arg0: i32) -> (i32, i32) {
    %c0_i32 = arith.constant 0 : i32
    %c0_i32_0 = arith.constant 0 : i32
    return %arg0, %c0_i32 : i32, i32
  }
  func.func @transform_1(%arg0: i32) -> (i32, i32) {
    %c0_i32 = arith.constant 0 : i32
    %c0_i32_0 = arith.constant 0 : i32
    %c0_i32_1 = arith.constant 0 : i32
    return %c0_i32, %c0_i32_0 : i32, i32
  }
  func.func @transform_2(%arg0: i32) -> (i32, i32) {
    %c0_i32 = arith.constant 0 : i32
    %c0_i32_0 = arith.constant 0 : i32
    %c0_i32_1 = arith.constant 0 : i32
    return %c0_i32, %c0_i32_0 : i32, i32
  }
  func.func @transform_3(%arg0: i32) -> (i32, i32) {
    %c0_i32 = arith.constant 0 : i32
    %c0_i32_0 = arith.constant 0 : i32
    %c0_i32_1 = arith.constant 0 : i32
    return %c0_i32, %c0_i32_0 : i32, i32
  }
  func.func @transform_4(%arg0: i32) -> (i32, i32) {
    %c0_i32 = arith.constant 0 : i32
    %c0_i32_0 = arith.constant 0 : i32
    %c0_i32_1 = arith.constant 0 : i32
    return %c0_i32, %c0_i32_0 : i32, i32
  }
  func.func @transform_5(%arg0: i32) -> (i32, i32) {
    %c0_i32 = arith.constant 0 : i32
    %c0_i32_0 = arith.constant 0 : i32
    %c0_i32_1 = arith.constant 0 : i32
    return %c0_i32, %c0_i32_0 : i32, i32
  }
  func.func @transform_6(%arg0: i32) -> (i32, i32) {
    %c0_i32 = arith.constant 0 : i32
    %c0_i32_0 = arith.constant 0 : i32
    %c0_i32_1 = arith.constant 0 : i32
    return %c0_i32, %c0_i32_0 : i32, i32
  }
  func.func @transform_7(%arg0: i32) -> (i32, i32) {
    %c0_i32 = arith.constant 0 : i32
    %c0_i32_0 = arith.constant 0 : i32
    return %arg0, %c0_i32 : i32, i32
  }
}

</mosaic_0001>

<bundles_post_ra>
// kernel: tpu_custom_call.1
= control target key start
LH: loop header
LB: loop body
LE: loop exit
PB: predicated region body
PF: predicated region fallthrough
CT: control target
= control target key end

     0   :  { %12 = vsyncpa [#allocation3], 0  ;;  %s939_s0 = inlined_call_operand.vmem [shape: f32[30,64], index: 0, kind: input, shape index: {}]   ;;  %s940_s1 = inlined_call_operand.vmem [shape: bf16[64,128], index: 1, kind: input, shape index: {}]   ;;  %s941_s2 = inlined_call_operand.vmem [shape: f32[1,128], index: 2, kind: input, shape index: {}]   ;;  %s942_s3 = inlined_call_operand.vmem [shape: f32[1,128], index: 3, kind: input, shape index: {}]   ;;  %s943_s4 = inlined_call_operand.vmem [shape: f32[1,128], index: 4, kind: input, shape index: {}]   ;;  %s944_s5 = inlined_call_operand.vmem [shape: bf16[128,32], index: 5, kind: input, shape index: {}]   ;;  %s945_s6 = inlined_call_operand.vmem [shape: f32[1,32], index: 6, kind: input, shape index: {}]   ;;  %s946_s7 = inlined_call_operand.hbm [shape: f32[30,32], index: 7, kind: output, shape index: {}]  }
   0x1   :  { %14 = vsyncpa [#allocation3 + $0x1], 0  ;;  %s806_s24 = smov 0   ;;  %s808_s25 = smov 0  }
   0x2   :  { %s810_s26 = smov 0   ;;  %s812_s27 = smov 0  }
   0x3 LB: > { %s827_s28 = sadd.s32 4294967295, %s763_s27   ;;  %s579_s29 = sadd.s32 4294967294, %s763_s27   ;;  %s763_s27 = sphi %s812_s27, %s952_s27   ;;  %s759_s26 = sphi %s810_s26, %s951_s26   ;;  %s755_s25 = sphi %s808_s25, %s950_s25   ;;  %s751_s24 = sphi %s806_s24, %s949_s24  }
   0x4   : > { %s831_s30 = sadd.s32 1, %s763_s27   ;;  %s179_s8 = sadd.s32 1, %s759_s26 }
   0x5   : > { %s176_s9 = ssub.s32 %s763_s27, %s831_s30  ;;  %p189_p0 = scmp.ne.s32.totalorder %s759_s26, %s755_s25 }
   0x6   : > { %p177_p1 = scmp.eq.s32.totalorder %s176_s9, 0  ;;  %p190_p2 = scmp.eq.s32.totalorder %s827_s28, 3 }
   0x7   : > { %p195_p3 = scmp.ne.s32.totalorder %s755_s25, %s751_s24  ;;  %p196_p4 = scmp.eq.s32.totalorder %s579_s29, 3 }
   0x8   : > { %s842_s10 = scalar_select %p177_p1, %s759_s26, %s179_s8  }
   0x9   : > { %p844_p5 = por %p190_p2, %p189_p0  ;;  %p848_p6 = por %p196_p4, %p195_p3 }
   0xa   : > { %p582_p7 = scmp.ge.s32.totalorder %s763_s27, 1  ;;  %p239_p8 = scmp.lt.s32.totalorder %s763_s27, 5 }
   0xc   : > { %p240_p9 = pnand %p582_p7, %p239_p8 }
   0xd   : > { %p270_p10 = scmp.lt.s32.totalorder (!%p240_p9), %s827_s28, 3  ;;  %s267_s21 = sand.u32 (!%p240_p9), 1, %s755_s25  }
   0xe   : > { %243 = sbr.rel (%p240_p9) target bundleno = 616 (0x268), region = 48  ;;  %s583_s23 = sshll.u32 (!%p240_p9), %s267_s21, 3 }
  0x13   : > { %v642_v0 = vld [vmem:[%s940_s1 + $0x18] sm:$0xff]  ;;  %v277_v1 = vlaneseq  ;;  %s280_s15 = scalar_select %p190_p2, 1, 0  ;;  %v641_v2 = vld [vmem:[%s940_s1 + $0x10] sm:$0xff]  ;;  %v640_v5 = vld [vmem:[%s940_s1 + $0x8] sm:$0xff]  ;;  %vm322_vm3 = vcmask 523264  }
  0x14   : > { %330 = vmatpush.bf16.msra.mxu0 %v642_v0  ;;  %s271_s18 = scalar_select %p270_p10, %s827_s28, 3  ;;  %v639_v7 = vld [vmem:[%s940_s1] sm:$0xff]  ;;  %v765_v53 = vmov 128.0   ;;  %v650_v54 = vld [vmem:[%s944_s5 + $0x38] sm:$0xff]  ;;  %vm502_vm12 = vcmask 261120  }
  0x15   : > { %v278_v3 = vshrl.u32 %v277_v1, 7  ;;  %v281_v4 = vstv %s280_s15  ;;  %v691_v10 = vld [vmem:[%s941_s2] ss:$0 sm:$0xff]  ;;  %489 = vmatpush.bf16.msra.mxu1 %v650_v54  ;;  %v649_v1 = vld [vmem:[%s944_s5 + $0x30] sm:$0xff]  ;;  %s269_s15 = scalar_lea.vmem [#allocation2], %s583_s23  ;;  %s721_s23 = scalar_lea.hbm %s946_s7, 32 }
  0x16   : > { %s584_s19 = sshll.u32 %s271_s18, 3  ;;  %vm282_vm1 = vcmp.eq.s32.totalorder %v281_v4, 1  ;;  %v646_v4 = vld [vmem:[%s944_s5 + $0x18] sm:$0xff]  ;;  %s517_s16 = sshll.u32 %s269_s15, 4  ;;  %s518_s16 = int_to_ptr.vmem [resolvable:$true] %s517_s16 }
  0x17   : > { %vm279_vm0 = vcmp.ge.s32.totalorder %v278_v3, 6  ;;  %s273_s22 = scalar_lea.vmem %s939_s0, %s584_s19  ;;  %v647_v3 = vld [vmem:[%s944_s5 + $0x20] sm:$0xff] }
  0x18   : > { %331 = vmatpush.bf16.msra.mxu0 %v641_v2  ;;  %v275_v6 = vld [vmem:[%s273_s22] sm:$0xff]  ;;  %vm283_vm2 = vmand %vm282_vm1, %vm279_vm0  ;;  %v648_v2 = vld [vmem:[%s944_s5 + $0x28] sm:$0xff]  ;;  %s636_s22 = sshll.u32 %s827_s28, 3  ;;  %s505_s28 = scalar_lea.sflag [#allocation3], %s267_s21 }
  0x19   : > { %v284_v8 = vsel %vm283_vm2, 0.0, %v275_v6  ;;  %490 = vmatpush.bf16.msra.mxu1 %v649_v1  ;;  %v644_v6 = vld [vmem:[%s944_s5 + $0x8] sm:$0xff]  ;;  %s515_s9 = scalar_lea.hbm %s946_s7, %s636_s22 }
  0x1a   : > { %v285_v9 = vpack.c.bf16 %v284_v8, %v284_v8  ;;  %s519_s17 = sshll.u32 %s515_s9, 4  ;;  %s520_s17 = int_to_ptr.hbm [resolvable:$true] %s519_s17 }
  0x1b   : > { %s715_s18 = sshra.s32 %s520_s17, 4  ;;  %s716_s18 = int_to_ptr.hbm [resolvable:$true] %s715_s18 }
  0x1c   : > { %332 = vmatpush.bf16.msra.mxu0 %v640_v5  ;;  %v645_v5 = vld [vmem:[%s944_s5 + $0x10] sm:$0xff]  ;;  %s717_s19 = scalar_lea.hbm %s716_s18, 8  ;;  %p722_p0 = scmp.lt.s32.totalorder %s716_s18, %s946_s7 }
  0x1d   : > { %491 = vmatpush.bf16.msra.mxu1 %v648_v2  ;;  %p718_p11 = scmp.ne.s32.totalorder %s716_s18, %s717_s19  ;;  %p723_p1 = scmp.lt.s32.totalorder %s721_s23, %s717_s19 }
  0x1f   : > { %p719_p12 = pnand %p718_p11, %p844_p5  ;;  %p724_p2 = por %p723_p1, %p722_p0 }
  0x20   : > { %333 = vmatpush.bf16.msra.mxu0 %v639_v7  ;;  %v643_v7 = vld [vmem:[%s944_s5] sm:$0xff] }
  0x21   : > { %492 = vmatpush.bf16.msra.mxu1 %v647_v3  ;;  %p720_p13 = pneg %p719_p12 }
  0x23   : > { %601 = vmatmul.msk.bf16.vlgmr.msra.gmra.mxu0 %vm322_vm3, %v285_v9  ;;  %p725_p3 = pnand %p724_p2, %p720_p13 }
  0x25   : > { %493 = vmatpush.bf16.msra.mxu1 %v646_v4 }
  0x29   : > { %494 = vmatpush.bf16.msra.mxu1 %v645_v5 }
  0x2d   : > { %495 = vmatpush.bf16.msra.mxu1 %v644_v6 }
  0x31   : > { %496 = vmatpush.bf16.msra.mxu1 %v643_v7 }
  0xa0   : > { %v335_v11 = vpop.f32.mrf.mxu0 }
  0xa1   : > { %v336_v12 = vadd.f32 %v691_v10, %v335_v11 }
  0xa3   : > { %v340_v13 = vmul.f32 0.70710677, %v336_v12  ;;  %v339_v50 = vmul.f32 0.5, %v336_v12 }
  0xa5   : > { %v341_v14 = vmul.f32 %v340_v13, %v340_v13 }
  0xa7   : > { %v342_v15 = vmin.f32 %v341_v14, 16.0 }
  0xa8   : > { %v337_v16 = vpop.f32.mrf.mxu0 }
  0xa9   : > { %v343_v17 = vmul.f32 2.1237322e-06, %v342_v15  ;;  %v354_v18 = vmul.f32 3.8918573e-05, %v342_v15 }
  0xab   : > { %v344_v19 = vadd.f32 0.00028619796, %v343_v17  ;;  %v355_v20 = vadd.f32 0.001143296, %v354_v18  ;;  %v692_v17 = vld [vmem:[%s942_s3] ss:$0 sm:$0xff] }
  0xad   : > { %v345_v21 = vmul.f32 %v344_v19, %v342_v15  ;;  %v356_v22 = vmul.f32 %v355_v20, %v342_v15  ;;  %v693_v20 = vld [vmem:[%s943_s4] ss:$0 sm:$0xff] }
  0xaf   : > { %v357_v23 = vadd.f32 0.014752088, %v356_v22  ;;  %v346_v24 = vadd.f32 0.0036580483, %v345_v21 }
  0xb1   : > { %v358_v25 = vmul.f32 %v357_v23, %v342_v15  ;;  %v347_v27 = vmul.f32 %v346_v24, %v342_v15  ;;  %v694_v24 = vld [vmem:[%s945_s6] ss:$0 sm:$0xff] }
  0xb3   : > { %v359_v26 = vadd.f32 0.112945676, %v358_v25  ;;  %v348_v30 = vadd.f32 0.05243302, %v347_v27 }
  0xb5   : > { %v360_v28 = vmul.f32 %v359_v26, %v342_v15  ;;  %v349_v33 = vmul.f32 %v348_v30, %v342_v15 }
  0xb7   : > { %v361_v29 = vadd.f32 0.4994258, %v360_v28  ;;  %v350_v34 = vadd.f32 0.18741608, %v349_v33 }
  0xb9   : > { %v362_v31 = vmul.f32 %v361_v29, %v342_v15  ;;  %v351_v36 = vmul.f32 %v350_v34, %v342_v15 }
  0xbb   : > { %v363_v32 = vadd.f32 1.0, %v362_v31  ;;  %v352_v40 = vadd.f32 1.1283791, %v351_v36 }
  0xbd   : > { %695 = vrcp.f32 %v363_v32  ;;  %v375_v39 = vand.u32 2147483648, %v363_v32  ;;  %v373_v42 = vand.u32 2147483647, %v363_v32  ;;  %vm369_vm5 = vweird.f32 %v363_v32 }
  0xbe   : > { %v353_v45 = vmul.f32 %v352_v40, %v340_v13  ;;  %697 = vrcp.f32 %v765_v53 }
  0xbf   : > { %v376_v44 = vor.u32 1.1754944e-38, %v375_v39  ;;  %vm374_vm7 = vcmp.eq.f32.partialorder %v373_v42, 8.507059e+37 }
  0xc3   : > { %v696_v35 = vpop.eup %695 }
  0xc4   : > { %v365_v37 = vmul.f32 %v696_v35, %v363_v32  ;;  %vm370_vm4 = vweird.f32 %v696_v35  ;;  %v698_v55 = vpop.eup %697 }
  0xc5   : > { %vm371_vm6 = vmor %vm369_vm5, %vm370_vm4  ;;  %v386_v56 = vmul.f32 128.0, %v698_v55  ;;  %vm390_vm8 = vweird.f32 %v698_v55 }
  0xc6   : > { %v366_v38 = vsub.f32 1.0, %v365_v37 }
  0xc7   : > { %v387_v57 = vsub.f32 1.0, %v386_v56 }
  0xc8   : > { %v367_v41 = vmul.f32 %v696_v35, %v366_v38 }
  0xc9   : > { %v388_v58 = vmul.f32 %v698_v55, %v387_v57 }
  0xca   : > { %v368_v43 = vadd.f32 %v696_v35, %v367_v41 }
  0xcb   : > { %v389_v59 = vadd.f32 %v698_v55, %v388_v58 }
  0xcc   : > { %v372_v46 = vsel %vm371_vm6, %v696_v35, %v368_v43 }
  0xcd   : > { %v377_v47 = vsel %vm374_vm7, %v376_v44, %v372_v46  ;;  %v391_v60 = vsel %vm390_vm8, %v698_v55, %v389_v59 }
  0xce   : > { %v378_v48 = vmul.f32 %v377_v47, %v353_v45 }
  0xd0   : > { %v602_v49 = vclamps-f32 %v378_v48, 1.0 }
  0xd2   : > { %v381_v51 = vadd.f32 1.0, %v602_v49 }
  0xd4   : > { %v382_v52 = vmul.f32 %v381_v51, %v339_v50 }
  0xd6   : > { %383 = vadd.xlane.f32.xlu0 %v382_v52 }
 0x149   : > { %v384_v61 = vpop.xlane.xlu0 %383 }
 0x14a   : > { %v392_v62 = vmul.f32 %v391_v60, %v384_v61 }
 0x14c   : > { %v393_v63 = vsub.f32 %v382_v52, %v392_v62 }
 0x14e   : > { %v394_v0 = vmul.f32 %v393_v63, %v393_v63 }
 0x150   : > { %395 = vadd.xlane.f32.xlu0 %v394_v0 }
 0x1c3   : > { %v396_v8 = vpop.xlane.xlu0 %395 }
 0x1c4   : > { %v397_v9 = vmul.f32 %v396_v8, %v391_v60 }
 0x1c6   : > { %v398_v10 = vadd.f32 1e-05, %v397_v9 }
 0x1c8   : > { %699 = vrsqrt.f32 %v398_v10  ;;  %vm405_vm10 = vweird.f32 %v398_v10 }
 0x1ce   : > { %v700_v11 = vpop.eup %699 }
 0x1cf   : > { %v400_v12 = vmul.f32 %v700_v11, %v398_v10  ;;  %vm406_vm9 = vweird.f32 %v700_v11 }
 0x1d0   : > { %vm407_vm11 = vmor %vm405_vm10, %vm406_vm9 }
 0x1d1   : > { %v401_v13 = vmul.f32 %v700_v11, %v400_v12 }
 0x1d3   : > { %v402_v14 = vmul.f32 0.5, %v401_v13 }
 0x1d5   : > { %v403_v15 = vsub.f32 1.5, %v402_v14 }
 0x1d7   : > { %v404_v16 = vmul.f32 %v700_v11, %v403_v15 }
 0x1d9   : > { %v408_v18 = vsel %vm407_vm11, %v700_v11, %v404_v16 }
 0x1da   : > { %v409_v19 = vmul.f32 %v408_v18, %v393_v63 }
 0x1dc   : > { %v414_v21 = vmul.f32 %v692_v17, %v409_v19 }
 0x1de   : > { %v419_v22 = vadd.f32 %v693_v20, %v414_v21 }
 0x1e0   : > { %v420_v23 = vpack.c.bf16 %v419_v22, %v419_v22 }
 0x1e2   : > { %497 = vmatmul.bf16.vlgmr.msra.gmra.mxu1 %v420_v23 }
 0x25f   : > { %v498_v25 = vpop.f32.mrf.mxu1 }
 0x260   : > { %v499_v26 = vadd.f32 %v694_v24, %v498_v25 }
 0x262   : > { %503 = vst.msk [vmem:[%s269_s15] sm:$0xff] %vm502_vm12, %v499_v26 }
 0x263   : > { %728 = shalt.err (!%p725_p3)
}
 0x264   : > { %651 = dma.vmem_to_hbm [thread:$0]  (%p844_p5), %s518_s16, 128, %s520_s17, %s505_s28  }
 0x267   : > { %v500_v27 = vpop.f32.mrf.mxu1 }
 0x268 PF: > { %p657_p4 = scmp.ge.s32.totalorder %s763_s27, 2  ;;  %s531_s21 = sand.u32 1, %s751_s24  }
 0x269   : > { %s532_s9 = scalar_lea.sflag [#allocation3], %s531_s21 }
 0x26a   : > { %p654_p7 = pnand %p657_p4, %p848_p6 }
 0x26c   : > { %p655_p8 = pneg %p654_p7 }
 0x26e   : > { %746 = dma.done.wait (%p655_p8), %s532_s9, 128  }
 0x26f   : > { %748 = vsyncadd (%p655_p8), %s532_s9, 4294967168  ;;  %p17_p9 = scmp.ge.s32.totalorder %s831_s30, 6   ;;  %s949_s24 = smov %s755_s25 }
 0x270   : > { %s950_s25 = smov %s759_s26  ;;  %s951_s26 = smov %s842_s10 }
 0x271   : > { %s952_s27 = smov %s831_s30  ;;  %19 = sbr.rel (!%p17_p9) target bundleno = 3 (0x3), region = 83 }
 0x276   :  { %538 = vsyncpa [#allocation3], 1 }
 0x277   :  { %540 = vsyncpa [#allocation3 + $0x1], 1 }

// kernel: tpu_custom_call.1
= control target key start
LH: loop header
LB: loop body
LE: loop exit
PB: predicated region body
PF: predicated region fallthrough
CT: control target
= control target key end

     0   :  { %12 = vsyncpa [#allocation3], 0  ;;  %s939_s0 = inlined_call_operand.vmem [shape: f32[30,64], index: 0, kind: input, shape index: {}]   ;;  %s940_s1 = inlined_call_operand.vmem [shape: bf16[64,128], index: 1, kind: input, shape index: {}]   ;;  %s941_s2 = inlined_call_operand.vmem [shape: f32[1,128], index: 2, kind: input, shape index: {}]   ;;  %s942_s3 = inlined_call_operand.vmem [shape: f32[1,128], index: 3, kind: input, shape index: {}]   ;;  %s943_s4 = inlined_call_operand.vmem [shape: f32[1,128], index: 4, kind: input, shape index: {}]   ;;  %s944_s5 = inlined_call_operand.vmem [shape: bf16[128,32], index: 5, kind: input, shape index: {}]   ;;  %s945_s6 = inlined_call_operand.vmem [shape: f32[1,32], index: 6, kind: input, shape index: {}]   ;;  %s946_s7 = inlined_call_operand.hbm [shape: f32[30,32], index: 7, kind: output, shape index: {}]  }
   0x1   :  { %14 = vsyncpa [#allocation3 + $0x1], 0  ;;  %s806_s24 = smov 0   ;;  %s808_s25 = smov 0  }
   0x2   :  { %s810_s26 = smov 0   ;;  %s812_s27 = smov 0  }
   0x3 LB: > { %s827_s28 = sadd.s32 4294967295, %s763_s27   ;;  %s579_s29 = sadd.s32 4294967294, %s763_s27   ;;  %s763_s27 = sphi %s812_s27, %s952_s27   ;;  %s759_s26 = sphi %s810_s26, %s951_s26   ;;  %s755_s25 = sphi %s808_s25, %s950_s25   ;;  %s751_s24 = sphi %s806_s24, %s949_s24  }
   0x4   : > { %s831_s30 = sadd.s32 1, %s763_s27   ;;  %s179_s8 = sadd.s32 1, %s759_s26 }
   0x5   : > { %s176_s9 = ssub.s32 %s763_s27, %s831_s30  ;;  %p189_p0 = scmp.ne.s32.totalorder %s759_s26, %s755_s25 }
   0x6   : > { %p177_p1 = scmp.eq.s32.totalorder %s176_s9, 0  ;;  %p190_p2 = scmp.eq.s32.totalorder %s827_s28, 3 }
   0x7   : > { %p195_p3 = scmp.ne.s32.totalorder %s755_s25, %s751_s24  ;;  %p196_p4 = scmp.eq.s32.totalorder %s579_s29, 3 }
   0x8   : > { %s842_s10 = scalar_select %p177_p1, %s759_s26, %s179_s8  }
   0x9   : > { %p844_p5 = por %p190_p2, %p189_p0  ;;  %p848_p6 = por %p196_p4, %p195_p3 }
   0xa   : > { %p582_p7 = scmp.ge.s32.totalorder %s763_s27, 1  ;;  %p239_p8 = scmp.lt.s32.totalorder %s763_s27, 5 }
   0xc   : > { %p240_p9 = pnand %p582_p7, %p239_p8 }
   0xd   : > { %p270_p10 = scmp.lt.s32.totalorder (!%p240_p9), %s827_s28, 3  ;;  %s267_s21 = sand.u32 (!%p240_p9), 1, %s755_s25  }
   0xe   : > { %243 = sbr.rel (%p240_p9) target bundleno = 616 (0x268), region = 48  ;;  %s583_s23 = sshll.u32 (!%p240_p9), %s267_s21, 3 }
  0x13   : > { %v642_v0 = vld [vmem:[%s940_s1 + $0x18] sm:$0xff]  ;;  %v277_v1 = vlaneseq  ;;  %s280_s15 = scalar_select %p190_p2, 1, 0  ;;  %v641_v2 = vld [vmem:[%s940_s1 + $0x10] sm:$0xff]  ;;  %v640_v5 = vld [vmem:[%s940_s1 + $0x8] sm:$0xff]  ;;  %vm322_vm3 = vcmask 523264  }
  0x14   : > { %330 = vmatpush.bf16.msra.mxu0 %v642_v0  ;;  %s271_s18 = scalar_select %p270_p10, %s827_s28, 3  ;;  %v639_v7 = vld [vmem:[%s940_s1] sm:$0xff]  ;;  %v765_v53 = vmov 128.0   ;;  %v650_v54 = vld [vmem:[%s944_s5 + $0x38] sm:$0xff]  ;;  %vm502_vm12 = vcmask 261120  }
  0x15   : > { %v278_v3 = vshrl.u32 %v277_v1, 7  ;;  %v281_v4 = vstv %s280_s15  ;;  %v691_v10 = vld [vmem:[%s941_s2] ss:$0 sm:$0xff]  ;;  %489 = vmatpush.bf16.msra.mxu1 %v650_v54  ;;  %v649_v1 = vld [vmem:[%s944_s5 + $0x30] sm:$0xff]  ;;  %s269_s15 = scalar_lea.vmem [#allocation2], %s583_s23  ;;  %s721_s23 = scalar_lea.hbm %s946_s7, 32 }
  0x16   : > { %s584_s19 = sshll.u32 %s271_s18, 3  ;;  %vm282_vm1 = vcmp.eq.s32.totalorder %v281_v4, 1  ;;  %v646_v4 = vld [vmem:[%s944_s5 + $0x18] sm:$0xff]  ;;  %s517_s16 = sshll.u32 %s269_s15, 4  ;;  %s518_s16 = int_to_ptr.vmem [resolvable:$true] %s517_s16 }
  0x17   : > { %vm279_vm0 = vcmp.ge.s32.totalorder %v278_v3, 6  ;;  %s273_s22 = scalar_lea.vmem %s939_s0, %s584_s19  ;;  %v647_v3 = vld [vmem:[%s944_s5 + $0x20] sm:$0xff] }
  0x18   : > { %331 = vmatpush.bf16.msra.mxu0 %v641_v2  ;;  %v275_v6 = vld [vmem:[%s273_s22] sm:$0xff]  ;;  %vm283_vm2 = vmand %vm282_vm1, %vm279_vm0  ;;  %v648_v2 = vld [vmem:[%s944_s5 + $0x28] sm:$0xff]  ;;  %s636_s22 = sshll.u32 %s827_s28, 3  ;;  %s505_s28 = scalar_lea.sflag [#allocation3], %s267_s21 }
  0x19   : > { %v284_v8 = vsel %vm283_vm2, 0.0, %v275_v6  ;;  %490 = vmatpush.bf16.msra.mxu1 %v649_v1  ;;  %v644_v6 = vld [vmem:[%s944_s5 + $0x8] sm:$0xff]  ;;  %s515_s9 = scalar_lea.hbm %s946_s7, %s636_s22 }
  0x1a   : > { %v285_v9 = vpack.c.bf16 %v284_v8, %v284_v8  ;;  %s519_s17 = sshll.u32 %s515_s9, 4  ;;  %s520_s17 = int_to_ptr.hbm [resolvable:$true] %s519_s17 }
  0x1b   : > { %s715_s18 = sshra.s32 %s520_s17, 4  ;;  %s716_s18 = int_to_ptr.hbm [resolvable:$true] %s715_s18 }
  0x1c   : > { %332 = vmatpush.bf16.msra.mxu0 %v640_v5  ;;  %v645_v5 = vld [vmem:[%s944_s5 + $0x10] sm:$0xff]  ;;  %s717_s19 = scalar_lea.hbm %s716_s18, 8  ;;  %p722_p0 = scmp.lt.s32.totalorder %s716_s18, %s946_s7 }
  0x1d   : > { %491 = vmatpush.bf16.msra.mxu1 %v648_v2  ;;  %p718_p11 = scmp.ne.s32.totalorder %s716_s18, %s717_s19  ;;  %p723_p1 = scmp.lt.s32.totalorder %s721_s23, %s717_s19 }
  0x1f   : > { %p719_p12 = pnand %p718_p11, %p844_p5  ;;  %p724_p2 = por %p723_p1, %p722_p0 }
  0x20   : > { %333 = vmatpush.bf16.msra.mxu0 %v639_v7  ;;  %v643_v7 = vld [vmem:[%s944_s5] sm:$0xff] }
  0x21   : > { %492 = vmatpush.bf16.msra.mxu1 %v647_v3  ;;  %p720_p13 = pneg %p719_p12 }
  0x23   : > { %601 = vmatmul.msk.bf16.vlgmr.msra.gmra.mxu0 %vm322_vm3, %v285_v9  ;;  %p725_p3 = pnand %p724_p2, %p720_p13 }
  0x25   : > { %493 = vmatpush.bf16.msra.mxu1 %v646_v4 }
  0x29   : > { %494 = vmatpush.bf16.msra.mxu1 %v645_v5 }
  0x2d   : > { %495 = vmatpush.bf16.msra.mxu1 %v644_v6 }
  0x31   : > { %496 = vmatpush.bf16.msra.mxu1 %v643_v7 }
  0xa0   : > { %v335_v11 = vpop.f32.mrf.mxu0 }
  0xa1   : > { %v336_v12 = vadd.f32 %v691_v10, %v335_v11 }
  0xa3   : > { %v340_v13 = vmul.f32 0.70710677, %v336_v12  ;;  %v339_v50 = vmul.f32 0.5, %v336_v12 }
  0xa5   : > { %v341_v14 = vmul.f32 %v340_v13, %v340_v13 }
  0xa7   : > { %v342_v15 = vmin.f32 %v341_v14, 16.0 }
  0xa8   : > { %v337_v16 = vpop.f32.mrf.mxu0 }
  0xa9   : > { %v343_v17 = vmul.f32 2.1237322e-06, %v342_v15  ;;  %v354_v18 = vmul.f32 3.8918573e-05, %v342_v15 }
  0xab   : > { %v344_v19 = vadd.f32 0.00028619796, %v343_v17  ;;  %v355_v20 = vadd.f32 0.001143296, %v354_v18  ;;  %v692_v17 = vld [vmem:[%s942_s3] ss:$0 sm:$0xff] }
  0xad   : > { %v345_v21 = vmul.f32 %v344_v19, %v342_v15  ;;  %v356_v22 = vmul.f32 %v355_v20, %v342_v15  ;;  %v693_v20 = vld [vmem:[%s943_s4] ss:$0 sm:$0xff] }
  0xaf   : > { %v357_v23 = vadd.f32 0.014752088, %v356_v22  ;;  %v346_v24 = vadd.f32 0.0036580483, %v345_v21 }
  0xb1   : > { %v358_v25 = vmul.f32 %v357_v23, %v342_v15  ;;  %v347_v27 = vmul.f32 %v346_v24, %v342_v15  ;;  %v694_v24 = vld [vmem:[%s945_s6] ss:$0 sm:$0xff] }
  0xb3   : > { %v359_v26 = vadd.f32 0.112945676, %v358_v25  ;;  %v348_v30 = vadd.f32 0.05243302, %v347_v27 }
  0xb5   : > { %v360_v28 = vmul.f32 %v359_v26, %v342_v15  ;;  %v349_v33 = vmul.f32 %v348_v30, %v342_v15 }
  0xb7   : > { %v361_v29 = vadd.f32 0.4994258, %v360_v28  ;;  %v350_v34 = vadd.f32 0.18741608, %v349_v33 }
  0xb9   : > { %v362_v31 = vmul.f32 %v361_v29, %v342_v15  ;;  %v351_v36 = vmul.f32 %v350_v34, %v342_v15 }
  0xbb   : > { %v363_v32 = vadd.f32 1.0, %v362_v31  ;;  %v352_v40 = vadd.f32 1.1283791, %v351_v36 }
  0xbd   : > { %695 = vrcp.f32 %v363_v32  ;;  %v375_v39 = vand.u32 2147483648, %v363_v32  ;;  %v373_v42 = vand.u32 2147483647, %v363_v32  ;;  %vm369_vm5 = vweird.f32 %v363_v32 }
  0xbe   : > { %v353_v45 = vmul.f32 %v352_v40, %v340_v13  ;;  %697 = vrcp.f32 %v765_v53 }
  0xbf   : > { %v376_v44 = vor.u32 1.1754944e-38, %v375_v39  ;;  %vm374_vm7 = vcmp.eq.f32.partialorder %v373_v42, 8.507059e+37 }
  0xc3   : > { %v696_v35 = vpop.eup %695 }
  0xc4   : > { %v365_v37 = vmul.f32 %v696_v35, %v363_v32  ;;  %vm370_vm4 = vweird.f32 %v696_v35  ;;  %v698_v55 = vpop.eup %697 }
  0xc5   : > { %vm371_vm6 = vmor %vm369_vm5, %vm370_vm4  ;;  %v386_v56 = vmul.f32 128.0, %v698_v55  ;;  %vm390_vm8 = vweird.f32 %v698_v55 }
  0xc6   : > { %v366_v38 = vsub.f32 1.0, %v365_v37 }
  0xc7   : > { %v387_v57 = vsub.f32 1.0, %v386_v56 }
  0xc8   : > { %v367_v41 = vmul.f32 %v696_v35, %v366_v38 }
  0xc9   : > { %v388_v58 = vmul.f32 %v698_v55, %v387_v57 }
  0xca   : > { %v368_v43 = vadd.f32 %v696_v35, %v367_v41 }
  0xcb   : > { %v389_v59 = vadd.f32 %v698_v55, %v388_v58 }
  0xcc   : > { %v372_v46 = vsel %vm371_vm6, %v696_v35, %v368_v43 }
  0xcd   : > { %v377_v47 = vsel %vm374_vm7, %v376_v44, %v372_v46  ;;  %v391_v60 = vsel %vm390_vm8, %v698_v55, %v389_v59 }
  0xce   : > { %v378_v48 = vmul.f32 %v377_v47, %v353_v45 }
  0xd0   : > { %v602_v49 = vclamps-f32 %v378_v48, 1.0 }
  0xd2   : > { %v381_v51 = vadd.f32 1.0, %v602_v49 }
  0xd4   : > { %v382_v52 = vmul.f32 %v381_v51, %v339_v50 }
  0xd6   : > { %383 = vadd.xlane.f32.xlu0 %v382_v52 }
 0x149   : > { %v384_v61 = vpop.xlane.xlu0 %383 }
 0x14a   : > { %v392_v62 = vmul.f32 %v391_v60, %v384_v61 }
 0x14c   : > { %v393_v63 = vsub.f32 %v382_v52, %v392_v62 }
 0x14e   : > { %v394_v0 = vmul.f32 %v393_v63, %v393_v63 }
 0x150   : > { %395 = vadd.xlane.f32.xlu0 %v394_v0 }
 0x1c3   : > { %v396_v8 = vpop.xlane.xlu0 %395 }
 0x1c4   : > { %v397_v9 = vmul.f32 %v396_v8, %v391_v60 }
 0x1c6   : > { %v398_v10 = vadd.f32 1e-05, %v397_v9 }
 0x1c8   : > { %699 = vrsqrt.f32 %v398_v10  ;;  %vm405_vm10 = vweird.f32 %v398_v10 }
 0x1ce   : > { %v700_v11 = vpop.eup %699 }
 0x1cf   : > { %v400_v12 = vmul.f32 %v700_v11, %v398_v10  ;;  %vm406_vm9 = vweird.f32 %v700_v11 }
 0x1d0   : > { %vm407_vm11 = vmor %vm405_vm10, %vm406_vm9 }
 0x1d1   : > { %v401_v13 = vmul.f32 %v700_v11, %v400_v12 }
 0x1d3   : > { %v402_v14 = vmul.f32 0.5, %v401_v13 }
 0x1d5   : > { %v403_v15 = vsub.f32 1.5, %v402_v14 }
 0x1d7   : > { %v404_v16 = vmul.f32 %v700_v11, %v403_v15 }
 0x1d9   : > { %v408_v18 = vsel %vm407_vm11, %v700_v11, %v404_v16 }
 0x1da   : > { %v409_v19 = vmul.f32 %v408_v18, %v393_v63 }
 0x1dc   : > { %v414_v21 = vmul.f32 %v692_v17, %v409_v19 }
 0x1de   : > { %v419_v22 = vadd.f32 %v693_v20, %v414_v21 }
 0x1e0   : > { %v420_v23 = vpack.c.bf16 %v419_v22, %v419_v22 }
 0x1e2   : > { %497 = vmatmul.bf16.vlgmr.msra.gmra.mxu1 %v420_v23 }
 0x25f   : > { %v498_v25 = vpop.f32.mrf.mxu1 }
 0x260   : > { %v499_v26 = vadd.f32 %v694_v24, %v498_v25 }
 0x262   : > { %503 = vst.msk [vmem:[%s269_s15] sm:$0xff] %vm502_vm12, %v499_v26 }
 0x263   : > { %728 = shalt.err (!%p725_p3)
}
 0x264   : > { %651 = dma.vmem_to_hbm [thread:$0]  (%p844_p5), %s518_s16, 128, %s520_s17, %s505_s28  }
 0x267   : > { %v500_v27 = vpop.f32.mrf.mxu1 }
 0x268 PF: > { %p657_p4 = scmp.ge.s32.totalorder %s763_s27, 2  ;;  %s531_s21 = sand.u32 1, %s751_s24  }
 0x269   : > { %s532_s9 = scalar_lea.sflag [#allocation3], %s531_s21 }
 0x26a   : > { %p654_p7 = pnand %p657_p4, %p848_p6 }
 0x26c   : > { %p655_p8 = pneg %p654_p7 }
 0x26e   : > { %746 = dma.done.wait (%p655_p8), %s532_s9, 128  }
 0x26f   : > { %748 = vsyncadd (%p655_p8), %s532_s9, 4294967168  ;;  %p17_p9 = scmp.ge.s32.totalorder %s831_s30, 6   ;;  %s949_s24 = smov %s755_s25 }
 0x270   : > { %s950_s25 = smov %s759_s26  ;;  %s951_s26 = smov %s842_s10 }
 0x271   : > { %s952_s27 = smov %s831_s30  ;;  %19 = sbr.rel (!%p17_p9) target bundleno = 3 (0x3), region = 83 }
 0x276   :  { %538 = vsyncpa [#allocation3], 1 }
 0x277   :  { %540 = vsyncpa [#allocation3 + $0x1], 1 }

</bundles_post_ra>
